<compile_context>
chip_gen: v6e
topology: v6e:2x2x1
jax: 0.10.0
libtpu: 0.0.40
codegen_flags: <defaults>
</compile_context>

<pallas_src>
import functools

import jax
import jax.numpy as jnp
from jax import lax
from jax.experimental import pallas as pl
from jax.experimental.pallas import tpu as pltpu


def _proxyfree_kernel(feats_ref, lab_col_ref, lab_row_ref, loss_ref,
                      fnb_ref, mx_ref, sp_ref, cp_ref, sn_ref, cn_ref,
                      *, alpha, r, m, bias, tb):
    p = pl.program_id(0)          # 0: global-max pass, 1: loss pass
    s = pl.program_id(1)          # row strip
    ns = pl.num_programs(1)
    B = fnb_ref.shape[0]

    # ---- one-time init: F.normalize (p=2, dim=1, eps=1e-12) and cache rows as bf16 ----
    @pl.when(jnp.logical_and(p == 0, s == 0))
    def _init():
        f = feats_ref[...].astype(jnp.float32)
        ss = jnp.sum(f * f, axis=1, keepdims=True)
        fn = f * lax.rsqrt(jnp.maximum(ss, 1e-24))     # == f / max(||f||, 1e-12)
        fnb_ref[...] = fn.astype(jnp.bfloat16)
        mx_ref[...] = jnp.zeros_like(mx_ref)
        sp_ref[...] = jnp.zeros_like(sp_ref)
        cp_ref[...] = jnp.zeros_like(cp_ref)
        sn_ref[...] = jnp.zeros_like(sn_ref)
        cn_ref[...] = jnp.zeros_like(cn_ref)
        loss_ref[...] = jnp.zeros_like(loss_ref)

    # ---- per-strip pairwise Euclidean similarity: rows [s*tb, s*tb+tb) vs all rows ----
    row0 = s * tb
    if tb % 8 == 0:
        row0 = pl.multiple_of(row0, 8)
    fstrip = fnb_ref[pl.ds(row0, tb), :]                                   # (tb, D) bf16
    gram = lax.dot_general(fstrip, fnb_ref[...], (((1,), (1,)), ((), ())),
                           preferred_element_type=jnp.float32)             # (tb, B) f32
    dist = 2.0 - 2.0 * gram                      # unit-norm rows => xx + yy == 2
    sim = jnp.sqrt(jnp.maximum(dist, 1e-12))     # clamp(min=1e-12).sqrt()

    rows = row0 + lax.broadcasted_iota(jnp.int32, (tb, B), 0)
    cols = lax.broadcasted_iota(jnp.int32, (tb, B), 1)
    diag = rows == cols
    sim = jnp.where(diag, 0.0, sim)              # sim_mat - diag_embed(diag(sim_mat))

    def _msum(x):
        return jnp.sum(jnp.sum(x, axis=1, keepdims=True), axis=0, keepdims=True)

    # ---- pass 0: running global max (global min is exactly 0: diag zeroed, sim >= 0) ----
    @pl.when(p == 0)
    def _pass_max():
        strip_mx = jnp.max(jnp.max(sim, axis=1, keepdims=True), axis=0, keepdims=True)
        mx_ref[...] = jnp.maximum(mx_ref[...], strip_mx)

    # ---- pass 1: rescale, fused softplus, masked partial sums ----
    @pl.when(p == 1)
    def _pass_loss():
        inv_mx = pl.reciprocal(mx_ref[...], approx=True)                   # (1, 1)
        simr = 1.0 - sim * inv_mx                    # (sim - min) / (max - min); min == 0

        same = lab_col_ref[...] == lab_row_ref[...]                        # (tb, B)
        mask_p = jnp.logical_and(same, jnp.logical_not(diag))              # fill_diagonal_(False)
        mask_n = jnp.logical_not(same)

        inv_r = 1.0 / r
        zp = (m - bias - simr) * inv_r      # == -logits_p  (target 1 -> softplus(-x))
        zn = (simr + m + bias) * r          # ==  logits_n  (target 0 -> softplus(x))
        z = jnp.where(same, zp, zn)         # disjoint masks -> single softplus evaluation
        spl = jnp.maximum(z, 0.0) + jnp.log(1.0 + jnp.exp(-jnp.abs(z)))

        fp = mask_p.astype(jnp.float32)
        fneg = mask_n.astype(jnp.float32)
        sp_ref[...] += _msum(spl * fp)
        cp_ref[...] += _msum(fp)
        sn_ref[...] += _msum(spl * fneg)
        cn_ref[...] += _msum(fneg)

    # ---- finalize: masked_select(...).mean() == masked sum / count ----
    @pl.when(jnp.logical_and(p == 1, s == ns - 1))
    def _finalize():
        loss_p = sp_ref[...] / cp_ref[...]
        loss_n = sn_ref[...] / cn_ref[...]
        loss_ref[...] = alpha * loss_p + (1.0 - alpha) * loss_n


def _pick_strip(B, target=256):
    """Largest row-strip <= target that is a multiple of 8 and divides B (else B itself)."""
    if B <= target:
        return B
    for tb in range(target, 0, -8):
        if B % tb == 0:
            return tb
    return B


def proxyfree_loss(feats, labels, *, alpha=0.01, r=1.0, m=0.0, bias=0.3, strip=256):
    """feats: (B, D) float32/bf16, labels: (B,) int. Returns scalar float32 loss."""
    B, D = feats.shape
    assert labels.shape[0] == B
    tb = _pick_strip(B, strip)
    n_strips = B // tb

    lab = labels.astype(jnp.int32)
    lab_col = lab.reshape(B, 1)
    lab_row = lab.reshape(1, B)

    kernel = functools.partial(_proxyfree_kernel, alpha=float(alpha), r=float(r),
                               m=float(m), bias=float(bias), tb=tb)

    out = pl.pallas_call(
        kernel,
        out_shape=jax.ShapeDtypeStruct((1, 1), jnp.float32),
        grid=(2, n_strips),
        in_specs=[
            pl.BlockSpec((B, D), lambda p, s: (0, 0)),     # feats: resident, native dtype
            pl.BlockSpec((tb, 1), lambda p, s: (s, 0)),    # labels column, strip-blocked
            pl.BlockSpec((1, B), lambda p, s: (0, 0)),     # labels row (lane-dense)
        ],
        out_specs=pl.BlockSpec((1, 1), lambda p, s: (0, 0)),
        scratch_shapes=[
            pltpu.VMEM((B, D), jnp.bfloat16),   # normalized feats (bf16 MXU operands)
            pltpu.VMEM((1, 1), jnp.float32),    # running global max
            pltpu.VMEM((1, 1), jnp.float32),    # sum softplus over positive pairs
            pltpu.VMEM((1, 1), jnp.float32),    # count of positive pairs
            pltpu.VMEM((1, 1), jnp.float32),    # sum softplus over negative pairs
            pltpu.VMEM((1, 1), jnp.float32),    # count of negative pairs
        ],
        compiler_params=pltpu.CompilerParams(
            dimension_semantics=("arbitrary", "arbitrary")),
    )(feats, lab_col, lab_row)
    return out[0, 0]


def _reference(feats, labels, *, alpha=0.01, r=1.0, m=0.0, bias=0.3):
    """Pure-JAX f32 replica of the PyTorch module (sans the fp16 cast)."""
    f = feats.astype(jnp.float32)
    nrm = jnp.sqrt(jnp.sum(f * f, axis=1, keepdims=True))
    fn = f / jnp.maximum(nrm, 1e-12)
    xx = jnp.sum(fn * fn, axis=1, keepdims=True)
    dist = xx + xx.T - 2.0 * (fn @ fn.T)
    sim = jnp.sqrt(jnp.maximum(dist, 1e-12))
    sim = sim - jnp.diag(jnp.diag(sim))
    mx, mn = jnp.max(sim), jnp.min(sim)
    sim = 1.0 - (sim - mn) / (mx - mn)
    same = labels[:, None] == labels[None, :]
    eye = jnp.eye(labels.shape[0], dtype=bool)
    mask_p = same & ~eye
    mask_n = ~same
    lp = (sim - m + bias) / r
    ln = (sim + m + bias) * r
    softplus = lambda x: jnp.maximum(x, 0.0) + jnp.log1p(jnp.exp(-jnp.abs(x)))
    loss_p = jnp.sum(jnp.where(mask_p, softplus(-lp), 0.0)) / jnp.sum(mask_p)
    loss_n = jnp.sum(jnp.where(mask_n, softplus(ln), 0.0)) / jnp.sum(mask_n)
    return alpha * loss_p + (1.0 - alpha) * loss_n


if __name__ == "__main__":
    key = jax.random.PRNGKey(0)
    B, D = 8, 32
    feats = jax.random.normal(key, (B, D), dtype=jnp.float32)
    # 4 classes, 2 samples each -> both positive and negative pairs exist.
    labels = jnp.array([0, 0, 1, 1, 2, 2, 3, 3], dtype=jnp.int32)

    loss = proxyfree_loss(feats, labels)
    jax.block_until_ready(loss)

    ref = _reference(feats, labels)
    if not bool(jnp.allclose(loss, ref, rtol=5e-2, atol=5e-3)):
        raise SystemExit(f"MISMATCH: kernel={float(loss)} ref={float(ref)}")
    print("KERNEL_OK")
</pallas_src>

<mosaic_0001>
module attributes {stable_mosaic.version = 11 : i64} {
  func.func @_proxyfree_kernel(%arg0: i32, %arg1: i32, %arg2: memref<8x32xf32, #tpu.memory_space<vmem>>, %arg3: memref<8x1xi32, #tpu.memory_space<vmem>>, %arg4: memref<1x8xi32, #tpu.memory_space<vmem>>, %arg5: memref<1x1xf32, #tpu.memory_space<vmem>>, %arg6: memref<8x32xbf16, #tpu.memory_space<vmem>>, %arg7: memref<1x1xf32, #tpu.memory_space<vmem>>, %arg8: memref<1x1xf32, #tpu.memory_space<vmem>>, %arg9: memref<1x1xf32, #tpu.memory_space<vmem>>, %arg10: memref<1x1xf32, #tpu.memory_space<vmem>>, %arg11: memref<1x1xf32, #tpu.memory_space<vmem>>) attributes {dimension_semantics = [#tpu.dimension_semantics<arbitrary>, #tpu.dimension_semantics<arbitrary>], iteration_bounds = array<i64: 2, 1>, scalar_prefetch = 0 : i64, scratch_operands = 6 : i64, tpu.core_type = #tpu.core_type<tc>, window_params = [{pipeline_mode = #tpu.pipeline_mode<synchronous>, transform_indices = @transform_0, window_bounds = array<i64: 8, 32>}, {transform_indices = @transform_1, window_bounds = array<i64: 8, 1>}, {pipeline_mode = #tpu.pipeline_mode<synchronous>, transform_indices = @transform_2, window_bounds = array<i64: 1, 8>}, {pipeline_mode = #tpu.pipeline_mode<synchronous>, transform_indices = @transform_3, window_bounds = array<i64: 1, 1>}]} {
    %c0_i32 = arith.constant 0 : i32
    %0 = arith.cmpi eq, %arg0, %c0_i32 : i32
    %c0_i32_0 = arith.constant 0 : i32
    %1 = arith.cmpi eq, %arg1, %c0_i32_0 : i32
    %2 = arith.andi %0, %1 : i1
    %3 = arith.extui %2 : i1 to i32
    %c0_i32_1 = arith.constant 0 : i32
    %4 = arith.cmpi ne, %3, %c0_i32_1 : i32
    scf.if %4 {
      %c0_14 = arith.constant 0 : index
      %c0_15 = arith.constant 0 : index
      %36 = vector.load %arg2[%c0_14, %c0_15] : memref<8x32xf32, #tpu.memory_space<vmem>>, vector<8x32xf32>
      %37 = arith.mulf %36, %36 : vector<8x32xf32>
      %cst_16 = arith.constant dense<0.000000e+00> : vector<8xf32>
      %38 = vector.multi_reduction <add>, %37, %cst_16 [1] : vector<8x32xf32> to vector<8xf32>
      %39 = vector.shape_cast %38 : vector<8xf32> to vector<8x1xf32>
      %cst_17 = arith.constant 1.000000e-24 : f32
      %40 = vector.broadcast %cst_17 : f32 to vector<8x1xf32>
      %41 = arith.maximumf %39, %40 : vector<8x1xf32>
      %42 = math.rsqrt %41 : vector<8x1xf32>
      %43 = vector.broadcast %42 : vector<8x1xf32> to vector<8x32xf32>
      %44 = arith.mulf %36, %43 : vector<8x32xf32>
      %45 = arith.truncf %44 : vector<8x32xf32> to vector<8x32xbf16>
      %c0_18 = arith.constant 0 : index
      %c0_19 = arith.constant 0 : index
      %46 = vector.load %arg6[%c0_18, %c0_19] : memref<8x32xbf16, #tpu.memory_space<vmem>>, vector<8x32xbf16>
      tpu.vector_store %arg6[%c0_18, %c0_19], %45 {strides = array<i32>} : memref<8x32xbf16, #tpu.memory_space<vmem>>, vector<8x32xbf16>,
      %cst_20 = arith.constant 0.000000e+00 : f32
      %47 = vector.broadcast %cst_20 : f32 to vector<1x1xf32>
      %c0_21 = arith.constant 0 : index
      %c0_22 = arith.constant 0 : index
      %48 = vector.load %arg7[%c0_21, %c0_22] : memref<1x1xf32, #tpu.memory_space<vmem>>, vector<1x1xf32>
      tpu.vector_store %arg7[%c0_21, %c0_22], %47 {strides = array<i32>} : memref<1x1xf32, #tpu.memory_space<vmem>>, vector<1x1xf32>,
      %cst_23 = arith.constant 0.000000e+00 : f32
      %49 = vector.broadcast %cst_23 : f32 to vector<1x1xf32>
      %c0_24 = arith.constant 0 : index
      %c0_25 = arith.constant 0 : index
      %50 = vector.load %arg8[%c0_24, %c0_25] : memref<1x1xf32, #tpu.memory_space<vmem>>, vector<1x1xf32>
      tpu.vector_store %arg8[%c0_24, %c0_25], %49 {strides = array<i32>} : memref<1x1xf32, #tpu.memory_space<vmem>>, vector<1x1xf32>,
      %cst_26 = arith.constant 0.000000e+00 : f32
      %51 = vector.broadcast %cst_26 : f32 to vector<1x1xf32>
      %c0_27 = arith.constant 0 : index
      %c0_28 = arith.constant 0 : index
      %52 = vector.load %arg9[%c0_27, %c0_28] : memref<1x1xf32, #tpu.memory_space<vmem>>, vector<1x1xf32>
      tpu.vector_store %arg9[%c0_27, %c0_28], %51 {strides = array<i32>} : memref<1x1xf32, #tpu.memory_space<vmem>>, vector<1x1xf32>,
      %cst_29 = arith.constant 0.000000e+00 : f32
      %53 = vector.broadcast %cst_29 : f32 to vector<1x1xf32>
      %c0_30 = arith.constant 0 : index
      %c0_31 = arith.constant 0 : index
      %54 = vector.load %arg10[%c0_30, %c0_31] : memref<1x1xf32, #tpu.memory_space<vmem>>, vector<1x1xf32>
      tpu.vector_store %arg10[%c0_30, %c0_31], %53 {strides = array<i32>} : memref<1x1xf32, #tpu.memory_space<vmem>>, vector<1x1xf32>,
      %cst_32 = arith.constant 0.000000e+00 : f32
      %55 = vector.broadcast %cst_32 : f32 to vector<1x1xf32>
      %c0_33 = arith.constant 0 : index
      %c0_34 = arith.constant 0 : index
      %56 = vector.load %arg11[%c0_33, %c0_34] : memref<1x1xf32, #tpu.memory_space<vmem>>, vector<1x1xf32>
      tpu.vector_store %arg11[%c0_33, %c0_34], %55 {strides = array<i32>} : memref<1x1xf32, #tpu.memory_space<vmem>>, vector<1x1xf32>,
      %cst_35 = arith.constant 0.000000e+00 : f32
      %57 = vector.broadcast %cst_35 : f32 to vector<1x1xf32>
      %c0_36 = arith.constant 0 : index
      %c0_37 = arith.constant 0 : index
      %58 = vector.load %arg5[%c0_36, %c0_37] : memref<1x1xf32, #tpu.memory_space<vmem>>, vector<1x1xf32>
      tpu.vector_store %arg5[%c0_36, %c0_37], %57 {strides = array<i32>} : memref<1x1xf32, #tpu.memory_space<vmem>>, vector<1x1xf32>,
    } else {
    }
    %c8_i32 = arith.constant 8 : i32
    %5 = arith.muli %arg1, %c8_i32 : i32
    %6 = tpu.assume_multiple %5, 8 : i32
    %7 = arith.index_cast %6 : i32 to index
    %c0 = arith.constant 0 : index
    %8 = vector.load %arg6[%7, %c0] : memref<8x32xbf16, #tpu.memory_space<vmem>>, vector<8x32xbf16>
    %c0_2 = arith.constant 0 : index
    %c0_3 = arith.constant 0 : index
    %9 = vector.load %arg6[%c0_2, %c0_3] : memref<8x32xbf16, #tpu.memory_space<vmem>>, vector<8x32xbf16>
    %cst = arith.constant dense<0.000000e+00> : vector<8x8xf32>
    %10 = tpu.matmul %8, %9, %cst {dimension_numbers = #tpu.dot_dimension_numbers<[1], [1], [0], [0], [0, 0, 1, 0], [], []>} : vector<8x32xbf16>, vector<8x32xbf16>, vector<8x8xf32> -> vector<8x8xf32>
    %cst_4 = arith.constant 2.000000e+00 : f32
    %11 = vector.broadcast %cst_4 : f32 to vector<8x8xf32>
    %12 = arith.mulf %11, %10 : vector<8x8xf32>
    %cst_5 = arith.constant 2.000000e+00 : f32
    %13 = vector.broadcast %cst_5 : f32 to vector<8x8xf32>
    %14 = arith.subf %13, %12 : vector<8x8xf32>
    %cst_6 = arith.constant 9.99999996E-13 : f32
    %15 = vector.broadcast %cst_6 : f32 to vector<8x8xf32>
    %16 = arith.maximumf %14, %15 : vector<8x8xf32>
    %17 = math.sqrt %16 : vector<8x8xf32>
    %18 = tpu.iota {dimensions = array<i32: 0>} : vector<8x8xi32>
    %19 = vector.broadcast %6 : i32 to vector<8x8xi32>
    %20 = arith.addi %19, %18 : vector<8x8xi32>
    %21 = tpu.iota {dimensions = array<i32: 1>} : vector<8x8xi32>
    %22 = arith.cmpi eq, %20, %21 : vector<8x8xi32>
    %cst_7 = arith.constant 0.000000e+00 : f32
    %23 = vector.broadcast %cst_7 : f32 to vector<8x8xf32>
    %24 = arith.select %22, %23, %17 : vector<8x8xi1>, vector<8x8xf32>
    %c0_i32_8 = arith.constant 0 : i32
    %25 = arith.cmpi eq, %arg0, %c0_i32_8 : i32
    %26 = arith.extui %25 : i1 to i32
    %c0_i32_9 = arith.constant 0 : i32
    %27 = arith.cmpi ne, %26, %c0_i32_9 : i32
    scf.if %27 {
      %cst_14 = arith.constant dense<0xFF800000> : vector<8xf32>
      %36 = vector.multi_reduction <maximumf>, %24, %cst_14 [1] : vector<8x8xf32> to vector<8xf32>
      %37 = vector.shape_cast %36 : vector<8xf32> to vector<8x1xf32>
      %cst_15 = arith.constant dense<0xFF800000> : vector<1xf32>
      %38 = vector.multi_reduction <maximumf>, %37, %cst_15 [0] : vector<8x1xf32> to vector<1xf32>
      %39 = vector.shape_cast %38 : vector<1xf32> to vector<1x1xf32>
      %c0_16 = arith.constant 0 : index
      %c0_17 = arith.constant 0 : index
      %40 = vector.load %arg7[%c0_16, %c0_17] : memref<1x1xf32, #tpu.memory_space<vmem>>, vector<1x1xf32>
      %41 = arith.maximumf %40, %39 : vector<1x1xf32>
      %c0_18 = arith.constant 0 : index
      %c0_19 = arith.constant 0 : index
      %42 = vector.load %arg7[%c0_18, %c0_19] : memref<1x1xf32, #tpu.memory_space<vmem>>, vector<1x1xf32>
      tpu.vector_store %arg7[%c0_18, %c0_19], %41 {strides = array<i32>} : memref<1x1xf32, #tpu.memory_space<vmem>>, vector<1x1xf32>,
    } else {
    }
    %c1_i32 = arith.constant 1 : i32
    %28 = arith.cmpi eq, %arg0, %c1_i32 : i32
    %29 = arith.extui %28 : i1 to i32
    %c0_i32_10 = arith.constant 0 : i32
    %30 = arith.cmpi ne, %29, %c0_i32_10 : i32
    scf.if %30 {
      %c0_14 = arith.constant 0 : index
      %c0_15 = arith.constant 0 : index
      %36 = vector.load %arg7[%c0_14, %c0_15] : memref<1x1xf32, #tpu.memory_space<vmem>>, vector<1x1xf32>
      %37 = tpu.reciprocal %36 {approx = true} : vector<1x1xf32> -> vector<1x1xf32>
      %38 = vector.broadcast %37 : vector<1x1xf32> to vector<8x8xf32>
      %39 = arith.mulf %24, %38 : vector<8x8xf32>
      %cst_16 = arith.constant 1.000000e+00 : f32
      %40 = vector.broadcast %cst_16 : f32 to vector<8x8xf32>
      %41 = arith.subf %40, %39 : vector<8x8xf32>
      %c0_17 = arith.constant 0 : index
      %c0_18 = arith.constant 0 : index
      %42 = vector.load %arg3[%c0_17, %c0_18] : memref<8x1xi32, #tpu.memory_space<vmem>>, vector<8x1xi32>
      %c0_19 = arith.constant 0 : index
      %c0_20 = arith.constant 0 : index
      %43 = vector.load %arg4[%c0_19, %c0_20] : memref<1x8xi32, #tpu.memory_space<vmem>>, vector<1x8xi32>
      %44 = vector.broadcast %42 : vector<8x1xi32> to vector<8x8xi32>
      %45 = vector.broadcast %43 : vector<1x8xi32> to vector<8x8xi32>
      %46 = arith.cmpi eq, %44, %45 : vector<8x8xi32>
      %cst_21 = arith.constant dense<true> : vector<8x8xi1>
      %47 = arith.xori %22, %cst_21 : vector<8x8xi1>
      %48 = arith.andi %46, %47 : vector<8x8xi1>
      %cst_22 = arith.constant dense<true> : vector<8x8xi1>
      %49 = arith.xori %46, %cst_22 : vector<8x8xi1>
      %cst_23 = arith.constant -3.000000e-01 : f32
      %50 = vector.broadcast %cst_23 : f32 to vector<8x8xf32>
      %51 = arith.subf %50, %41 : vector<8x8xf32>
      %cst_24 = arith.constant 1.000000e+00 : f32
      %52 = vector.broadcast %cst_24 : f32 to vector<8x8xf32>
      %53 = arith.mulf %51, %52 : vector<8x8xf32>
      %cst_25 = arith.constant 0.000000e+00 : f32
      %54 = vector.broadcast %cst_25 : f32 to vector<8x8xf32>
      %55 = arith.addf %41, %54 : vector<8x8xf32>
      %cst_26 = arith.constant 3.000000e-01 : f32
      %56 = vector.broadcast %cst_26 : f32 to vector<8x8xf32>
      %57 = arith.addf %55, %56 : vector<8x8xf32>
      %cst_27 = arith.constant 1.000000e+00 : f32
      %58 = vector.broadcast %cst_27 : f32 to vector<8x8xf32>
      %59 = arith.mulf %57, %58 : vector<8x8xf32>
      %60 = arith.select %46, %53, %59 : vector<8x8xi1>, vector<8x8xf32>
      %cst_28 = arith.constant 0.000000e+00 : f32
      %61 = vector.broadcast %cst_28 : f32 to vector<8x8xf32>
      %62 = arith.maximumf %60, %61 : vector<8x8xf32>
      %63 = math.absf %60 : vector<8x8xf32>
      %cst_29 = arith.constant 0.000000e+00 : f32
      %64 = vector.broadcast %cst_29 : f32 to vector<8x8xf32>
      %65 = arith.subf %64, %63 : vector<8x8xf32>
      %66 = math.exp %65 : vector<8x8xf32>
      %cst_30 = arith.constant 1.000000e+00 : f32
      %67 = vector.broadcast %cst_30 : f32 to vector<8x8xf32>
      %68 = arith.addf %67, %66 : vector<8x8xf32>
      %69 = math.log %68 : vector<8x8xf32>
      %70 = arith.addf %62, %69 : vector<8x8xf32>
      %71 = arith.extui %48 : vector<8x8xi1> to vector<8x8xi32>
      %72 = arith.sitofp %71 : vector<8x8xi32> to vector<8x8xf32>
      %73 = arith.extui %49 : vector<8x8xi1> to vector<8x8xi32>
      %74 = arith.sitofp %73 : vector<8x8xi32> to vector<8x8xf32>
      %c0_31 = arith.constant 0 : index
      %c0_32 = arith.constant 0 : index
      %75 = vector.load %arg8[%c0_31, %c0_32] : memref<1x1xf32, #tpu.memory_space<vmem>>, vector<1x1xf32>
      %76 = arith.mulf %70, %72 : vector<8x8xf32>
      %cst_33 = arith.constant dense<0.000000e+00> : vector<8xf32>
      %77 = vector.multi_reduction <add>, %76, %cst_33 [1] : vector<8x8xf32> to vector<8xf32>
      %78 = vector.shape_cast %77 : vector<8xf32> to vector<8x1xf32>
      %cst_34 = arith.constant dense<0.000000e+00> : vector<1xf32>
      %79 = vector.multi_reduction <add>, %78, %cst_34 [0] : vector<8x1xf32> to vector<1xf32>
      %80 = vector.shape_cast %79 : vector<1xf32> to vector<1x1xf32>
      %81 = arith.addf %75, %80 : vector<1x1xf32>
      %c0_35 = arith.constant 0 : index
      %c0_36 = arith.constant 0 : index
      %82 = vector.load %arg8[%c0_35, %c0_36] : memref<1x1xf32, #tpu.memory_space<vmem>>, vector<1x1xf32>
      tpu.vector_store %arg8[%c0_35, %c0_36], %81 {strides = array<i32>} : memref<1x1xf32, #tpu.memory_space<vmem>>, vector<1x1xf32>,
      %c0_37 = arith.constant 0 : index
      %c0_38 = arith.constant 0 : index
      %83 = vector.load %arg9[%c0_37, %c0_38] : memref<1x1xf32, #tpu.memory_space<vmem>>, vector<1x1xf32>
      %cst_39 = arith.constant dense<0.000000e+00> : vector<8xf32>
      %84 = vector.multi_reduction <add>, %72, %cst_39 [1] : vector<8x8xf32> to vector<8xf32>
      %85 = vector.shape_cast %84 : vector<8xf32> to vector<8x1xf32>
      %cst_40 = arith.constant dense<0.000000e+00> : vector<1xf32>
      %86 = vector.multi_reduction <add>, %85, %cst_40 [0] : vector<8x1xf32> to vector<1xf32>
      %87 = vector.shape_cast %86 : vector<1xf32> to vector<1x1xf32>
      %88 = arith.addf %83, %87 : vector<1x1xf32>
      %c0_41 = arith.constant 0 : index
      %c0_42 = arith.constant 0 : index
      %89 = vector.load %arg9[%c0_41, %c0_42] : memref<1x1xf32, #tpu.memory_space<vmem>>, vector<1x1xf32>
      tpu.vector_store %arg9[%c0_41, %c0_42], %88 {strides = array<i32>} : memref<1x1xf32, #tpu.memory_space<vmem>>, vector<1x1xf32>,
      %c0_43 = arith.constant 0 : index
      %c0_44 = arith.constant 0 : index
      %90 = vector.load %arg10[%c0_43, %c0_44] : memref<1x1xf32, #tpu.memory_space<vmem>>, vector<1x1xf32>
      %91 = arith.mulf %70, %74 : vector<8x8xf32>
      %cst_45 = arith.constant dense<0.000000e+00> : vector<8xf32>
      %92 = vector.multi_reduction <add>, %91, %cst_45 [1] : vector<8x8xf32> to vector<8xf32>
      %93 = vector.shape_cast %92 : vector<8xf32> to vector<8x1xf32>
      %cst_46 = arith.constant dense<0.000000e+00> : vector<1xf32>
      %94 = vector.multi_reduction <add>, %93, %cst_46 [0] : vector<8x1xf32> to vector<1xf32>
      %95 = vector.shape_cast %94 : vector<1xf32> to vector<1x1xf32>
      %96 = arith.addf %90, %95 : vector<1x1xf32>
      %c0_47 = arith.constant 0 : index
      %c0_48 = arith.constant 0 : index
      %97 = vector.load %arg10[%c0_47, %c0_48] : memref<1x1xf32, #tpu.memory_space<vmem>>, vector<1x1xf32>
      tpu.vector_store %arg10[%c0_47, %c0_48], %96 {strides = array<i32>} : memref<1x1xf32, #tpu.memory_space<vmem>>, vector<1x1xf32>,
      %c0_49 = arith.constant 0 : index
      %c0_50 = arith.constant 0 : index
      %98 = vector.load %arg11[%c0_49, %c0_50] : memref<1x1xf32, #tpu.memory_space<vmem>>, vector<1x1xf32>
      %cst_51 = arith.constant dense<0.000000e+00> : vector<8xf32>
      %99 = vector.multi_reduction <add>, %74, %cst_51 [1] : vector<8x8xf32> to vector<8xf32>
      %100 = vector.shape_cast %99 : vector<8xf32> to vector<8x1xf32>
      %cst_52 = arith.constant dense<0.000000e+00> : vector<1xf32>
      %101 = vector.multi_reduction <add>, %100, %cst_52 [0] : vector<8x1xf32> to vector<1xf32>
      %102 = vector.shape_cast %101 : vector<1xf32> to vector<1x1xf32>
      %103 = arith.addf %98, %102 : vector<1x1xf32>
      %c0_53 = arith.constant 0 : index
      %c0_54 = arith.constant 0 : index
      %104 = vector.load %arg11[%c0_53, %c0_54] : memref<1x1xf32, #tpu.memory_space<vmem>>, vector<1x1xf32>
      tpu.vector_store %arg11[%c0_53, %c0_54], %103 {strides = array<i32>} : memref<1x1xf32, #tpu.memory_space<vmem>>, vector<1x1xf32>,
    } else {
    }
    %c1_i32_11 = arith.constant 1 : i32
    %31 = arith.cmpi eq, %arg0, %c1_i32_11 : i32
    %c0_i32_12 = arith.constant 0 : i32
    %32 = arith.cmpi eq, %arg1, %c0_i32_12 : i32
    %33 = arith.andi %31, %32 : i1
    %34 = arith.extui %33 : i1 to i32
    %c0_i32_13 = arith.constant 0 : i32
    %35 = arith.cmpi ne, %34, %c0_i32_13 : i32
    scf.if %35 {
      %c0_14 = arith.constant 0 : index
      %c0_15 = arith.constant 0 : index
      %36 = vector.load %arg8[%c0_14, %c0_15] : memref<1x1xf32, #tpu.memory_space<vmem>>, vector<1x1xf32>
      %c0_16 = arith.constant 0 : index
      %c0_17 = arith.constant 0 : index
      %37 = vector.load %arg9[%c0_16, %c0_17] : memref<1x1xf32, #tpu.memory_space<vmem>>, vector<1x1xf32>
      %38 = arith.divf %36, %37 : vector<1x1xf32>
      %c0_18 = arith.constant 0 : index
      %c0_19 = arith.constant 0 : index
      %39 = vector.load %arg10[%c0_18, %c0_19] : memref<1x1xf32, #tpu.memory_space<vmem>>, vector<1x1xf32>
      %c0_20 = arith.constant 0 : index
      %c0_21 = arith.constant 0 : index
      %40 = vector.load %arg11[%c0_20, %c0_21] : memref<1x1xf32, #tpu.memory_space<vmem>>, vector<1x1xf32>
      %41 = arith.divf %39, %40 : vector<1x1xf32>
      %cst_22 = arith.constant 0.00999999977 : f32
      %42 = vector.broadcast %cst_22 : f32 to vector<1x1xf32>
      %43 = arith.mulf %42, %38 : vector<1x1xf32>
      %cst_23 = arith.constant 9.900000e-01 : f32
      %44 = vector.broadcast %cst_23 : f32 to vector<1x1xf32>
      %45 = arith.mulf %44, %41 : vector<1x1xf32>
      %46 = arith.addf %43, %45 : vector<1x1xf32>
      %c0_24 = arith.constant 0 : index
      %c0_25 = arith.constant 0 : index
      %47 = vector.load %arg5[%c0_24, %c0_25] : memref<1x1xf32, #tpu.memory_space<vmem>>, vector<1x1xf32>
      tpu.vector_store %arg5[%c0_24, %c0_25], %46 {strides = array<i32>} : memref<1x1xf32, #tpu.memory_space<vmem>>, vector<1x1xf32>,
    } else {
    }
    return
  }
  func.func @transform_0(%arg0: i32, %arg1: i32) -> (i32, i32) {
    %c0_i32 = arith.constant 0 : i32
    %c0_i32_0 = arith.constant 0 : i32
    %c0_i32_1 = arith.constant 0 : i32
    return %c0_i32, %c0_i32_0 : i32, i32
  }
  func.func @transform_1(%arg0: i32, %arg1: i32) -> (i32, i32) {
    %c0_i32 = arith.constant 0 : i32
    %c0_i32_0 = arith.constant 0 : i32
    return %arg1, %c0_i32 : i32, i32
  }
  func.func @transform_2(%arg0: i32, %arg1: i32) -> (i32, i32) {
    %c0_i32 = arith.constant 0 : i32
    %c0_i32_0 = arith.constant 0 : i32
    %c0_i32_1 = arith.constant 0 : i32
    return %c0_i32, %c0_i32_0 : i32, i32
  }
  func.func @transform_3(%arg0: i32, %arg1: i32) -> (i32, i32) {
    %c0_i32 = arith.constant 0 : i32
    %c0_i32_0 = arith.constant 0 : i32
    %c0_i32_1 = arith.constant 0 : i32
    return %c0_i32, %c0_i32_0 : i32, i32
  }
}

</mosaic_0001>

<bundles_post_ra>
// kernel: tpu_custom_call.1
= control target key start
LH: loop header
LB: loop body
LE: loop exit
PB: predicated region body
PF: predicated region fallthrough
CT: control target
= control target key end

     0   :  { %8 = vsyncpa [#allocation9], 0  ;;  %s614_s12 = smov 0   ;;  %s616_s13 = smov 0   ;;  %s691_s0 = inlined_call_operand.vmem [shape: f32[8,32], index: 0, kind: input, shape index: {}]   ;;  %s692_s1 = inlined_call_operand.vmem [shape: s32[8,1], index: 1, kind: input, shape index: {}]   ;;  %s693_s2 = inlined_call_operand.vmem [shape: s32[1,8], index: 2, kind: input, shape index: {}]   ;;  %s694_s3 = inlined_call_operand.hbm [shape: f32[1,1], index: 3, kind: output, shape index: {}]  }
   0x1   :  { %s618_s14 = smov 0  }
   0x2 LB: > { %s457_s15 = sadd.s32 4294967295, %s585_s14   ;;  %s26_s16 = sadd.s32 1, %s581_s13  ;;  %s585_s14 = sphi %s618_s14, %s14_s14   ;;  %s581_s13 = sphi %s616_s13, %s697_s13   ;;  %s577_s12 = sphi %s614_s12, %s696_s12  }
   0x3   : > { %p28_p0 = scmp.ge.s32.totalorder %s26_s16, 2  ;;  %p460_p1 = scmp.ge.s32.totalorder %s585_s14, 1 }
   0x4   : > { %p144_p2 = scmp.lt.s32.totalorder %s585_s14, 3 }
   0x5   : > { %s699_s16 = smov (%p28_p0, %s26_s16), 0 }
   0x6   : > { %p145_p3 = pnand %p460_p1, %p144_p2 }
   0x7   : > { %p167_p4 = scmp.eq.s32.totalorder (!%p145_p3), %s577_s12, 0 }
   0x8   : > { %148 = sbr.rel (%p145_p3) target bundleno = 962 (0x3c2), region = 32 }
   0xd   : > { %172 = sbr.rel (!%p167_p4) target bundleno = 176 (0xb0), region = 36  ;;  %v173_v0 = vld [vmem:[%s691_s0] sm:$0xff] (%p167_p4)  ;;  %vm175_vm0 = vcmask (%p167_p4), 261120   ;;  %vm185_vm1 = vcmask (%p167_p4), 0   ;;  %v587_v3 = vmov (%p167_p4), 0.0   ;;  %vm183_vm2 = vcmask (%p167_p4), 257024  }
   0xe   : > { %v174_v1 = vmul.f32 (%p167_p4), %v173_v0, %v173_v0  ;;  %186 = vst.msk [vmem:[#allocation3] sm:$0x1] (%p167_p4), %vm185_vm1, %v587_v3  ;;  %187 = vst.msk [vmem:[#allocation4] sm:$0x1] (%p167_p4), %vm185_vm1, %v587_v3 }
   0xf   : > { %188 = vst.msk [vmem:[#allocation5] sm:$0x1] (%p167_p4), %vm185_vm1, %v587_v3  ;;  %189 = vst.msk [vmem:[#allocation6] sm:$0x1] (%p167_p4), %vm185_vm1, %v587_v3 }
  0x10   : > { %v176_v2 = vsel (%p167_p4), %vm175_vm0, %v174_v1, 0.0  ;;  %190 = vst.msk [vmem:[#allocation7] sm:$0x1] (%p167_p4), %vm185_vm1, %v587_v3  ;;  %191 = vst.msk [vmem:[#allocation8] sm:$0x1] (%p167_p4), %vm185_vm1, %v587_v3 }
  0x11   : > { %177 = vadd.xlane.f32.xlu0 (%p167_p4), %v176_v2 }
  0x9a   : > { %v178_v4 = vpop.xlane.xlu0 %177 }
  0x9b   : > { %v179_v5 = vmax.f32 %v178_v4, 1e-24 }
  0x9d   : > { %520 = vrsqrt.f32 %v179_v5 }
  0xaa   : > { %v521_v6 = vpop.eup %520 }
  0xab   : > { %v181_v7 = vmul.f32 %v521_v6, %v173_v0 }
  0xad   : > { %v182_v8 = vpack.c.bf16 %v181_v7, %v181_v7 }
  0xaf   : > { %184 = vst.msk [vmem:[#allocation2] sm:$0xf] %vm183_vm2, %v182_v8 }
  0xb0 PF: > { %vm199_vm3 = vcmask 261120   ;;  %v588_v10 = vmov 0.0   ;;  %vm589_vm4 = vmmov 0   ;;  %v256_v20 = vlaneseq  ;;  %p463_p5 = scmp.ne.s32.totalorder %s577_s12, 0 }
  0xb1   : > { %477 = vmatprep.subr.bf16.mxu0 %v588_v10  ;;  %479 = vmatprep.mubr.msk.bf16.mxu0 %vm589_vm4, %v588_v10 }
  0xb2   : > { %v257_v21 = vshrl.u32 %v256_v20, 7  ;;  %v261_v22 = vand.u32 127, %v256_v20 }
  0xb4   : > { %vm262_vm6 = vcmp.eq.s32.totalorder %v257_v21, %v261_v22 }
  0xb6   : > { %v198_v9 = vld [vmem:[#allocation2] sm:$0xf] }
  0xb7   : > { %v204_v11 = vsel %vm199_vm3, %v198_v9, 0  ;;  %v197_v12 = vld [vmem:[#allocation2] sm:$0xf] }
  0xb8   : > { %478 = vmatpush3.bf16.xpose.msra.mxu0 %v204_v11 }
  0xbf   : > { %480 = vmatmul.mubr.msk.bf16.vlgmr.msra.gmra.mxu0 %vm199_vm3, %v197_v12 }
 0x17f   : > { %v240_v13 = vpop.f32.mrf.mxu0 }
 0x180   : > { %v246_v14 = vmul.f32 2.0, %v240_v13 }
 0x181   : > { %v481_v15 = vpop.f32.mrf.mxu0 }
 0x182   : > { %v247_v16 = vsub.f32 2.0, %v246_v14 }
 0x183   : > { %v243_v17 = vpop.f32.mrf.mxu0 }
 0x184   : > { %v248_v18 = vmax.f32 %v247_v16, 1e-12 }
 0x185   : > { %v482_v19 = vpop.f32.mrf.mxu0 }
 0x186   : > { %522 = vrsqrt.f32 %v248_v18  ;;  %vm251_vm5 = vcmp.eq.f32.partialorder %v248_v18, inf  ;;  %v254_v25 = vand.u32 2147483648, %v248_v18  ;;  %vm253_vm7 = vcmp.eq.f32.partialorder %v248_v18, 0.0 }
 0x193   : > { %v523_v23 = vpop.eup %522 }
 0x194   : > { %v250_v24 = vmul.f32 %v523_v23, %v248_v18  ;;  %266 = sbr.rel (%p463_p5) target bundleno = 564 (0x234), region = 40 }
 0x196   : > { %v252_v26 = vsel %vm251_vm5, %v248_v18, %v250_v24 }
 0x197   : > { %v255_v27 = vsel %vm253_vm7, %v254_v25, %v252_v26 }
 0x198   : > { %v263_v28 = vsel %vm262_vm6, 0.0, %v255_v27 }
 0x199   : > { %vm267_vm8 = vcmask 64512   ;;  %v277_v36 = vld [vmem:[#allocation3] sm:$0x1]  ;;  %vm279_vm9 = vcmask 0  }
 0x19a   : > { %v268_v29 = vsel %vm267_vm8, %v263_v28, -inf }
 0x19b   : > { %269 = vmax.xlane.f32.xlu0 %v268_v29 }
 0x224   : > { %v270_v30 = vpop.xlane.xlu0 %269 }
 0x225   : > { %v271_v31 = vrot.slane %v270_v30, 4 }
 0x227   : > { %v272_v32 = vmax.f32 %v270_v30, %v271_v31 }
 0x229   : > { %v273_v33 = vrot.slane %v272_v32, 2 }
 0x22b   : > { %v274_v34 = vmax.f32 %v272_v32, %v273_v33 }
 0x22d   : > { %v275_v35 = vrot.slane %v274_v34, 1 }
 0x22f   : > { %v276_v37 = vmax.f32 %v274_v34, %v275_v35 }
 0x231   : > { %v278_v38 = vmax.f32 %v277_v36, %v276_v37 }
 0x233   : > { %280 = vst.msk [vmem:[#allocation3] sm:$0x1] %vm279_vm9, %v278_v38 }
 0x234 PF: > { %p281_p6 = scmp.eq.s32.totalorder %s577_s12, 1  ;;  %p464_p7 = scmp.ne.s32.totalorder %s577_s12, 1 }
 0x236   : > { %284 = sbr.rel (%p464_p7) target bundleno = 919 (0x397), region = 44 }
 0x23b   : > { %v285_v39 = vld [vmem:[#allocation3] sm:$0x1]  ;;  %v590_v40 = vmov 0   ;;  %v290_v41 = vsub.s32 0, %v257_v21  ;;  %v465_v47 = vld [vmem:[%s693_s2] ss:$0 sm:$0xff] }
 0x23c   : > { %524 = vset.pattern.permute.xlu0 %v590_v40  ;;  %525 = vrcp.f32 %v285_v39  ;;  %v298_v44 = vld [vmem:[%s692_s1] sm:$0xff]  ;;  %vm591_vm10 = vmmov 1   ;;  %vm330_vm13 = vcmask 64512   ;;  %v592_v54 = vmov 0.0   ;;  %v368_v40 = vld [vmem:[#allocation7] sm:$0x1] }
 0x23d   : > { %vm308_vm11 = vmxor %vm262_vm6, %vm591_vm10  ;;  %v343_v13 = vld [vmem:[#allocation5] sm:$0x1]  ;;  %vm341_vm0 = vcmask 0   ;;  %v355_v32 = vld [vmem:[#allocation6] sm:$0x1] }
 0x23e   : > { %v328_v33 = vld [vmem:[#allocation4] sm:$0x1] }
 0x249   : > { %v526_v42 = vpop.eup %525 }
 0x24a   : > { %v291_v43 = vrot.slane %v526_v42, %v290_v41 }
 0x24c   : > { %293 = vperm.xlu0 %524, %v291_v43  }
 0x250   : > { %301 = vperm.xlu0 %524, %v298_v44  }
 0x2c7   : > { %v294_v45 = vpop.permute.xlu0 %293 }
 0x2c8   : > { %v296_v46 = vmul.f32 %v294_v45, %v263_v28 }
 0x2ca   : > { %v297_v48 = vsub.f32 1.0, %v296_v46 }
 0x2cb   : > { %v302_v49 = vpop.permute.xlu0 %301 }
 0x2cc   : > { %v311_v50 = vsub.f32 -0.3, %v297_v48  ;;  %v313_v51 = vadd.f32 0.3, %v297_v48  ;;  %vm307_vm12 = vcmp.eq.s32.totalorder %v302_v49, %v465_v47 }
 0x2cd   : > { %vm309_vm14 = vmand %vm307_vm12, %vm308_vm11 }
 0x2ce   : > { %v314_v52 = vsel %vm307_vm12, %v311_v50, %v313_v51  ;;  %v466_v55 = vsel %vm309_vm14, 1.0, %v592_v54  ;;  %vm310_vm15 = vmxor %vm307_vm12, %vm591_vm10 }
 0x2cf   : > { %v316_v53 = vand.u32 2147483647, %v314_v52  ;;  %v344_v56 = vsel %vm330_vm13, %v466_v55, 0.0  ;;  %v315_v62 = vmax.f32 %v314_v52, 0.0  ;;  %v467_v1 = vsel %vm310_vm15, 1.0, %v592_v54 }
 0x2d0   : > { %345 = vadd.xlane.f32.xlu1 %v344_v56  ;;  %v369_v6 = vsel %vm330_vm13, %v467_v1, 0.0 }
 0x2d1   : > { %v317_v57 = vsub.f32 0.0, %v316_v53 }
 0x2d3   : > { %v318_v58 = vmul.f32 1.442695, %v317_v57 }
 0x2d5   : > { %527 = vpow2.f32 %v318_v58 }
 0x2e2   : > { %v528_v59 = vpop.eup %527 }
 0x2e3   : > { %v320_v60 = vadd.f32 1.0, %v528_v59 }
 0x2e5   : > { %529 = vlog2.f32 %v320_v60 }
 0x2f2   : > { %v530_v61 = vpop.eup %529 }
 0x2f3   : > { %v322_v63 = vmul.f32 0.6931472, %v530_v61 }
 0x2f5   : > { %v323_v0 = vadd.f32 %v322_v63, %v315_v62 }
 0x2f7   : > { %v329_v2 = vmul.f32 %v466_v55, %v323_v0  ;;  %v356_v3 = vmul.f32 %v467_v1, %v323_v0 }
 0x2f9   : > { %v357_v4 = vsel %vm330_vm13, %v356_v3, 0.0  ;;  %v331_v5 = vsel %vm330_vm13, %v329_v2, 0.0 }
 0x2fa   : > { %358 = vadd.xlane.f32.xlu0 %v357_v4  ;;  %332 = vadd.xlane.f32.xlu1 %v331_v5 }
 0x2fe   : > { %370 = vadd.xlane.f32.xlu1 %v369_v6 }
 0x359   : > { %v346_v7 = vpop.xlane.xlu1 %345 }
 0x35a   : > { %v347_v8 = vrot.slane %v346_v7, 4 }
 0x35c   : > { %v348_v9 = vadd.f32 %v347_v8, %v346_v7 }
 0x35e   : > { %v349_v10 = vrot.slane %v348_v9, 2 }
 0x360   : > { %v350_v11 = vadd.f32 %v349_v10, %v348_v9 }
 0x362   : > { %v351_v12 = vrot.slane %v350_v11, 1 }
 0x364   : > { %v352_v14 = vadd.f32 %v351_v12, %v350_v11 }
 0x366   : > { %v353_v15 = vadd.f32 %v352_v14, %v343_v13 }
 0x368   : > { %354 = vst.msk [vmem:[#allocation5] sm:$0x1] %vm341_vm0, %v353_v15 }
 0x383   : > { %v359_v16 = vpop.xlane.xlu0 %358  ;;  %v333_v17 = vpop.xlane.xlu1 %332 }
 0x384   : > { %v360_v18 = vrot.slane %v359_v16, 4  ;;  %v334_v19 = vrot.slane %v333_v17, 4 }
 0x386   : > { %v361_v20 = vadd.f32 %v360_v18, %v359_v16  ;;  %v335_v21 = vadd.f32 %v334_v19, %v333_v17 }
 0x387   : > { %v371_v22 = vpop.xlane.xlu1 %370 }
 0x388   : > { %v362_v23 = vrot.slane %v361_v20, 2  ;;  %v336_v24 = vrot.slane %v335_v21, 2  ;;  %v372_v25 = vrot.slane %v371_v22, 4 }
 0x38a   : > { %v363_v26 = vadd.f32 %v362_v23, %v361_v20  ;;  %v337_v27 = vadd.f32 %v336_v24, %v335_v21  ;;  %v373_v28 = vadd.f32 %v372_v25, %v371_v22 }
 0x38c   : > { %v364_v29 = vrot.slane %v363_v26, 1  ;;  %v338_v30 = vrot.slane %v337_v27, 1  ;;  %v374_v31 = vrot.slane %v373_v28, 2 }
 0x38e   : > { %v365_v34 = vadd.f32 %v364_v29, %v363_v26  ;;  %v339_v35 = vadd.f32 %v338_v30, %v337_v27  ;;  %v375_v36 = vadd.f32 %v374_v31, %v373_v28 }
 0x390   : > { %v366_v37 = vadd.f32 %v365_v34, %v355_v32  ;;  %v340_v38 = vadd.f32 %v339_v35, %v328_v33  ;;  %v376_v39 = vrot.slane %v375_v36, 1 }
 0x392   : > { %367 = vst.msk [vmem:[#allocation6] sm:$0x1] %vm341_vm0, %v366_v37  ;;  %342 = vst.msk [vmem:[#allocation4] sm:$0x1] %vm341_vm0, %v340_v38  ;;  %v377_v41 = vadd.f32 %v376_v39, %v375_v36 }
 0x394   : > { %v378_v42 = vadd.f32 %v377_v41, %v368_v40 }
 0x396   : > { %379 = vst.msk [vmem:[#allocation7] sm:$0x1] %vm341_vm0, %v378_v42 }
 0x397 PF: > { %383 = sbr.rel (!%p281_p6) target bundleno = 947 (0x3b3), region = 48  ;;  %v385_v43 = vld [vmem:[#allocation5] sm:$0x1] (%p281_p6)  ;;  %vm395_vm1 = vcmask (%p281_p6), 0  }
 0x398   : > { %531 = vrcp.f32 (%p281_p6), %v385_v43 }
 0x399   : > { %v384_v45 = vld [vmem:[#allocation4] sm:$0x1] (%p281_p6)  ;;  %v388_v46 = vld [vmem:[#allocation6] sm:$0x1] (%p281_p6) }
 0x39d   : > { %v389_v44 = vld [vmem:[#allocation7] sm:$0x1] }
 0x39e   : > { %533 = vrcp.f32 %v389_v44 }
 0x3a5   : > { %v532_v47 = vpop.eup %531 }
 0x3a6   : > { %v387_v49 = vmul.f32 %v532_v47, %v384_v45 }
 0x3a8   : > { %v392_v51 = vmul.f32 0.01, %v387_v49 }
 0x3ab   : > { %v534_v48 = vpop.eup %533 }
 0x3ac   : > { %v391_v50 = vmul.f32 %v534_v48, %v388_v46 }
 0x3ae   : > { %v393_v52 = vmul.f32 0.99, %v391_v50 }
 0x3b0   : > { %v394_v53 = vadd.f32 %v393_v52, %v392_v51 }
 0x3b2   : > { %396 = vst.msk [vmem:[#allocation8] sm:$0x1] %vm395_vm1, %v394_v53 }
 0x3b3 PF: > { %p667_p8 = scmp.eq.s32.totalorder %s457_s15, 1  ;;  %s593_s24 = smov [#allocation8]  }
 0x3b4   : > { %s404_s25 = sshll.u32 %s593_s24, 4  ;;  %s405_s25 = int_to_ptr.vmem [resolvable:$true] %s404_s25 }
 0x3b5   : > { %s535_s26 = scalar_lea.vmem %s405_s25, 16  ;;  %s541_s27 = scalar_lea.vmem %s405_s25, 32 }
 0x3b6   : > { %p536_p9 = scmp.ne.s32.totalorder %s405_s25, %s535_s26  ;;  %p542_p12 = scmp.lt.s32.totalorder %s405_s25, %s405_s25 }
 0x3b7   : > { %p543_p13 = scmp.lt.s32.totalorder %s541_s27, %s535_s26 }
 0x3b8   : > { %p537_p10 = pnand %p536_p9, %p667_p8 }
 0x3b9   : > { %p544_p0 = por %p543_p13, %p542_p12 }
 0x3ba   : > { %p538_p11 = pneg %p537_p10 }
 0x3bc   : > { %p545_p1 = pnand %p544_p0, %p538_p11 }
 0x3be   : > { %548 = shalt.err (!%p545_p1)
}
 0x3bf   : > { %484 = dma.vmem_to_hbm [thread:$0]  (%p667_p8), %s405_s25, 16, %s694_s3, [#allocation9]  }
 0x3c0   : > { %572 = dma.done.wait (%p667_p8), [#allocation9], 16  }
 0x3c1   : > { %574 = vsyncadd (%p667_p8), [#allocation9], 4294967280 }
 0x3c2 PF: > { %s14_s14 = sadd.s32 1, %s585_s14   ;;  %s696_s12 = smov %s581_s13 }
 0x3c3   : > { %p11_p2 = scmp.ge.s32.totalorder %s14_s14, 4   ;;  %s697_s13 = smov %s699_s16 }
 0x3c5   :  { %13 = sbr.rel (!%p11_p2) target bundleno = 2 (0x2), region = 76 }
 0x3ca   :  { %417 = vsyncpa [#allocation9], 1 }
 0x3cb   :  { %419 = vsyncpa [#allocation9 + $0x1], 1 }

</bundles_post_ra>
